<compile_context>
chip_gen: v6e
topology: v6e:2x2x1
jax: 0.10.0
libtpu: 0.0.40
codegen_flags: <defaults>
</compile_context>

<pallas_src>
from functools import partial

import numpy as np
import jax
import jax.numpy as jnp
from jax.experimental import pallas as pl
from jax.experimental.pallas import tpu as pltpu


def _round_up(v, m):
    return -(-v // m) * m


def _vmem_capacity_bytes():
    """Detected per-core VMEM capacity (64 MiB v7x, 128 MiB v5e/v6e)."""
    try:
        info = pltpu.get_tpu_info()
        cap = getattr(info, "vmem_capacity_bytes", None)
        if cap:
            return int(cap)
    except Exception:
        pass
    return 64 * 1024 * 1024   # conservative (v7x-sized) fallback


def _taps(KH, KW, pad):
    for kh in range(KH):
        for kw in range(KW):
            yield kh * KW + kw, kh - pad, kw - pad


# --------------------------------------------------------------------------
# Kernels
# --------------------------------------------------------------------------

def _conv_kernel_im2col(x_ref, w_ref, m_ref, b_ref, o_ref, patch_ref,
                        *, W, KH, KW, pad):
    """Fused-K im2col path (tiny Cin).

    x_ref:     (Bt, Cin_p, HW)        input block (lane axis = H*W)
    w_ref:     (Cout, KH*KW*Cin_p)    taps folded into one contraction axis
    m_ref:     (KH*KW, HW)            precomputed boundary masks (x dtype)
    b_ref:     (Cout, 1)              bias
    o_ref:     (Bt, Cout, HW)         lane-dense output block
    patch_ref: (2, KH*KW*Cin_p, HW)   double-buffered per-image im2col patch
    """
    Bt, Cin, HW = x_ref.shape
    x = x_ref[...]
    w = w_ref[...]                                   # small; stays resident
    bias = b_ref[...].astype(jnp.float32)

    for b in range(Bt):
        slot = b & 1                                 # break WAR chain between images
        xb = x[b]                                    # (Cin_p, HW)
        # Stage patch: row t*Cin_p + ci = (kh,kw)-shifted channel ci.  Cin_p is
        # sublane-aligned, so every tap store is a full aligned tile store.
        for t, dh, dw in _taps(KH, KW, pad):
            if dh == 0 and dw == 0:
                tap = xb
            else:
                d = dh * W + dw
                tap = pltpu.roll(xb, (-d) % HW, 1) * m_ref[t:t + 1, :]
            patch_ref[slot, t * Cin:(t + 1) * Cin, :] = tap
        # One weight-stationary 2-D MXU contraction (no broadcast weight /
        # batched einsum); f32 accumulation.
        acc = jnp.dot(w, patch_ref[slot], preferred_element_type=jnp.float32)
        o_ref[b] = (acc + bias).astype(o_ref.dtype)


def _conv_kernel_direct(x_ref, w_ref, m_ref, b_ref, o_ref, acc_ref,
                        *, W, KH, KW, pad):
    """Direct tap-accumulation path (Cin >= 32): no im2col patch.

    x_ref:   (Bt, Cin_p, HW)
    w_ref:   (KH*KW, Cout, Cin_p)   one (Cout, Cin_p) slab per tap
    m_ref:   (KH*KW, HW)            precomputed boundary masks (x dtype)
    b_ref:   (Cout, 1)
    o_ref:   (Bt, Cout, HW)
    acc_ref: (2, Cout, HW) f32      double-buffered accumulator scratch
    """
    Bt, Cin, HW = x_ref.shape
    x = x_ref[...]
    bias = b_ref[...].astype(jnp.float32)

    for b in range(Bt):
        slot = b & 1
        xb = x[b]                                    # (Cin_p, HW)
        for t, dh, dw in _taps(KH, KW, pad):
            if dh == 0 and dw == 0:
                tap = xb
            else:
                d = dh * W + dw
                tap = pltpu.roll(xb, (-d) % HW, 1) * m_ref[t:t + 1, :]
            part = jnp.dot(w_ref[t], tap, preferred_element_type=jnp.float32)
            if t == 0:
                acc_ref[slot] = part
            else:
                acc_ref[slot] = acc_ref[slot] + part
        o_ref[b] = (acc_ref[slot] + bias).astype(o_ref.dtype)


# --------------------------------------------------------------------------
# Tiling heuristic (generation-aware)
# --------------------------------------------------------------------------

def _pick_batch_tile(B, cin_p, cout, k_p, hw, itemsize, *,
                     use_im2col, n_in_bufs, vmem_cap):
    """Images per grid step, sized from detected VMEM capacity.

    MiB-scale tiles amortize the ~0.35 us per-step overhead; >= 2 grid steps
    are kept when B >= 2 so both v7x TensorCores get work (free on v5e/v6e)."""
    budget = min(max(vmem_cap // 4, 8 << 20), 32 << 20)
    max_bt = 32 if vmem_cap >= (96 << 20) else 16
    lanes = _round_up(max(hw, 128), 128)
    cin_r = _round_up(cin_p, 8)
    cout_r = _round_up(cout, 8)
    # Per-image (scales with Bt): pipelined input + output buffers.
    per_image = itemsize * lanes * (n_in_bufs * cin_r + 2 * cout_r)
    # Fixed (independent of Bt): weight, masks, bias, per-image scratch x2.
    fixed = 2 * itemsize * cout * _round_up(k_p, 128)
    fixed += itemsize * lanes * 16 + 4 * cout_r * 128
    if use_im2col:
        fixed += 2 * itemsize * lanes * _round_up(k_p, 8)   # double-buffered patch
    else:
        fixed += 2 * 4 * lanes * cout_r                     # double-buffered f32 acc
    cap = max(1, (budget - fixed) // per_image)
    cap = min(cap, max_bt)
    if B >= 2:
        cap = min(cap, max(1, B // 2))    # keep >= 2 grid steps for the 2 v7x TCs
    return int(max(1, min(cap, B)))


# --------------------------------------------------------------------------
# Wrapper
# --------------------------------------------------------------------------

def spike_conv2d_pallas(x_nchw, weight_oihw, bias, *, padding, compute_dtype=None):
    """Stride-1 'same' conv2d: (B, Cin, H, W) -> (B, Cout, H, W)."""
    B, Cin, H, W = x_nchw.shape
    Cout, Cin_w, KH, KW = weight_oihw.shape
    assert Cin_w == Cin
    HW = H * W
    pad = padding

    out_dtype = x_nchw.dtype
    cdt = jnp.dtype(compute_dtype) if compute_dtype is not None else jnp.dtype(out_dtype)
    itemsize = cdt.itemsize
    sub = max(8, 32 // itemsize)              # sublane multiple: 8 f32, 16 bf16
    cin_p = _round_up(Cin, sub)
    k_p = KH * KW * cin_p
    use_im2col = Cin < 32                     # direct tap accumulation otherwise

    # ---- operand preparation (cheap XLA ops) --------------------------------
    x_flat = x_nchw.reshape(B, Cin, HW).astype(cdt)     # free reshape of contiguous mem
    if cin_p != Cin:                                    # align Cin to the sublane multiple
        x_flat = jnp.pad(x_flat, ((0, 0), (0, cin_p - Cin), (0, 0)))

    w_taps = jnp.transpose(weight_oihw, (0, 2, 3, 1))   # (Cout, KH, KW, Cin), tap-major
    if cin_p != Cin:                                    # matching zero-padded weight cols
        w_taps = jnp.pad(w_taps, ((0, 0), (0, 0), (0, 0), (0, cin_p - Cin)))
    if use_im2col:
        w_arg = w_taps.reshape(Cout, k_p).astype(cdt)
        w_spec = pl.BlockSpec((Cout, k_p), lambda i: (0, 0))
    else:
        w_arg = jnp.transpose(w_taps, (1, 2, 0, 3)).reshape(KH * KW, Cout, cin_p).astype(cdt)
        w_spec = pl.BlockSpec((KH * KW, Cout, cin_p), lambda i: (0, 0, 0))

    bias2d = bias.reshape(Cout, 1).astype(jnp.float32)

    # Precomputed per-tap boundary masks (replaces in-kernel int compares).
    hh = np.repeat(np.arange(H), W)
    ww = np.tile(np.arange(W), H)
    masks = np.zeros((KH * KW, HW), np.float32)
    for t, dh, dw in _taps(KH, KW, pad):
        masks[t] = ((hh + dh >= 0) & (hh + dh < H) & (ww + dw >= 0) & (ww + dw < W))
    masks = jnp.asarray(masks, dtype=cdt)

    # ---- tiling / VMEM budgeting --------------------------------------------
    vmem_cap = _vmem_capacity_bytes()
    deep_pipeline = vmem_cap >= (96 << 20)    # 3-deep input prefetch on 128-MiB parts
    n_in_bufs = 3 if deep_pipeline else 2
    Bt = _pick_batch_tile(B, cin_p, Cout, k_p, HW, itemsize,
                          use_im2col=use_im2col, n_in_bufs=n_in_bufs,
                          vmem_cap=vmem_cap)
    num_blocks = -(-B // Bt)
    Bp = num_blocks * Bt
    if Bp != B:                               # Bt need not divide B: zero-pad the batch
        x_flat = jnp.pad(x_flat, ((0, Bp - B), (0, 0), (0, 0)))

    x_index = lambda i: (i, 0, 0)
    x_spec = pl.BlockSpec((Bt, cin_p, HW), x_index)
    if deep_pipeline:
        try:
            x_spec = pl.BlockSpec((Bt, cin_p, HW), x_index,
                                  pipeline_mode=pl.Buffered(3))
        except Exception:
            pass   # older BlockSpec without pipeline_mode: keep default depth

    if use_im2col:
        kernel = partial(_conv_kernel_im2col, W=W, KH=KH, KW=KW, pad=pad)
        scratch = [pltpu.VMEM((2, k_p, HW), cdt)]
    else:
        kernel = partial(_conv_kernel_direct, W=W, KH=KH, KW=KW, pad=pad)
        scratch = [pltpu.VMEM((2, Cout, HW), jnp.float32)]

    out = pl.pallas_call(
        kernel,
        out_shape=jax.ShapeDtypeStruct((Bp, Cout, HW), out_dtype),
        grid_spec=pltpu.PrefetchScalarGridSpec(
            num_scalar_prefetch=0,
            grid=(num_blocks,),
            in_specs=[x_spec,
                      w_spec,
                      pl.BlockSpec((KH * KW, HW), lambda i: (0, 0)),
                      pl.BlockSpec((Cout, 1), lambda i: (0, 0))],
            out_specs=pl.BlockSpec((Bt, Cout, HW), lambda i: (i, 0, 0)),
            scratch_shapes=scratch,
        ),
        compiler_params=pltpu.CompilerParams(
            dimension_semantics=("parallel",),
            vmem_limit_bytes=int(min(vmem_cap * 3 // 4, 96 << 20)),
        ),
        cost_estimate=pl.CostEstimate(
            flops=2 * Bp * HW * k_p * Cout,
            transcendentals=0,
            bytes_accessed=(Bp * cin_p * HW + Cout * k_p + Bp * Cout * HW) * itemsize,
        ),
    )(x_flat, w_arg, masks, bias2d)

    if Bp != B:
        out = out[:B]
    return out.reshape(B, Cout, H, W)


class SpikeConvPallas:
    """JAX/Pallas port of SpikeConv (conv = nn.Conv2d(Cin, Cout, k, stride=1, pad=(k-1)//2))."""

    def __init__(self, weight_oihw, bias, step=2, stride=1, padding=1, compute_dtype=None):
        Cout, Cin, KH, KW = weight_oihw.shape
        # Kernel assumes a stride-1 "same" conv (what SpikeConv is used with);
        # fail loudly for other configs instead of silently reading wrong windows.
        assert stride == 1, "SpikeConvPallas: only stride=1 supported"
        assert KH == 2 * padding + 1 and KW == 2 * padding + 1, \
            "SpikeConvPallas: requires a 'same' conv (kernel = 2*padding + 1)"
        self.step = step
        self.padding = padding
        self.weight = weight_oihw
        self.bias = bias
        self.compute_dtype = compute_dtype   # e.g. jnp.bfloat16 for the MXU-native path
        self._spiking = False

    def set_spike_state(self, use_spike=True):
        self._spiking = use_spike

    def _conv(self, x_nchw):
        return spike_conv2d_pallas(x_nchw, self.weight, self.bias,
                                   padding=self.padding,
                                   compute_dtype=self.compute_dtype)

    def __call__(self, x):
        if self._spiking is not True:
            return self._conv(x)                        # out = self.conv(x)
        # spiking: stack([conv(x[t])]) == one conv over the flattened T*N batch
        T, N = x.shape[0], x.shape[1]
        flat = x.reshape((T * N,) + x.shape[2:])
        out = self._conv(flat)
        return out.reshape((T, N) + out.shape[1:])


def _reference_conv_nchw(x_nchw, weight_oihw, bias, padding=1):
    out = jax.lax.conv_general_dilated(
        x_nchw, weight_oihw,
        window_strides=(1, 1),
        padding=[(padding, padding), (padding, padding)],
        dimension_numbers=("NCHW", "OIHW", "NCHW"),
        precision=jax.lax.Precision.HIGHEST,
    )
    return out + bias.reshape(1, -1, 1, 1)


if __name__ == "__main__":
    key = jax.random.PRNGKey(0)
    k1, k2, k3, k4, k5, k6, k7 = jax.random.split(key, 7)

    # --- small-Cin (im2col path): nn.Conv2d(4, 8, 3, padding=1), step=2 ------
    step, N, Cin, Cout, H, W, Kk = 2, 2, 4, 8, 16, 16, 3
    fan_in = Cin * Kk * Kk
    weight = jax.random.normal(k1, (Cout, Cin, Kk, Kk), jnp.float32) * (1.0 / fan_in) ** 0.5
    bias = jax.random.normal(k2, (Cout,), jnp.float32) * 0.1
    module = SpikeConvPallas(weight, bias, step=step, padding=1)

    # non-spiking path: plain conv on (N, C, H, W)
    x = jax.random.normal(k3, (N, Cin, H, W), jnp.float32)
    y = jax.block_until_ready(module(x))
    y_ref = _reference_conv_nchw(x, weight, bias)
    assert y.shape == (N, Cout, H, W)
    assert jnp.allclose(y, y_ref, atol=2e-4, rtol=2e-4), \
        float(jnp.max(jnp.abs(y - y_ref)))

    # spiking path: per-timestep conv on (step, N, C, H, W), stacked
    module.set_spike_state(True)
    xs = jax.random.normal(k4, (step, N, Cin, H, W), jnp.float32)
    ys = jax.block_until_ready(module(xs))
    ys_ref = jnp.stack([_reference_conv_nchw(xs[t], weight, bias) for t in range(step)])
    assert ys.shape == (step, N, Cout, H, W)
    assert jnp.allclose(ys, ys_ref, atol=2e-4, rtol=2e-4), \
        float(jnp.max(jnp.abs(ys - ys_ref)))

    # --- larger-Cin (direct tap-accumulation path) + non-divisor batch pad ----
    B2, Cin2, Cout2 = 5, 32, 16
    fan_in2 = Cin2 * Kk * Kk
    weight2 = jax.random.normal(k5, (Cout2, Cin2, Kk, Kk), jnp.float32) * (1.0 / fan_in2) ** 0.5
    bias2 = jax.random.normal(k6, (Cout2,), jnp.float32) * 0.1
    module2 = SpikeConvPallas(weight2, bias2, step=step, padding=1)
    x2 = jax.random.normal(k7, (B2, Cin2, H, W), jnp.float32)
    y2 = jax.block_until_ready(module2(x2))
    y2_ref = _reference_conv_nchw(x2, weight2, bias2)
    assert y2.shape == (B2, Cout2, H, W)
    assert jnp.allclose(y2, y2_ref, atol=5e-4, rtol=5e-4), \
        float(jnp.max(jnp.abs(y2 - y2_ref)))

    print("KERNEL_OK")
</pallas_src>

<mosaic_0001>
module attributes {stable_mosaic.version = 11 : i64} {
  func.func @_conv_kernel_im2col(%arg0: i32, %arg1: memref<1x8x256xf32, #tpu.memory_space<vmem>>, %arg2: memref<8x72xf32, #tpu.memory_space<vmem>>, %arg3: memref<9x256xf32, #tpu.memory_space<vmem>>, %arg4: memref<8x1xf32, #tpu.memory_space<vmem>>, %arg5: memref<1x8x256xf32, #tpu.memory_space<vmem>>, %arg6: memref<2x72x256xf32, #tpu.memory_space<vmem>>) attributes {dimension_semantics = [#tpu.dimension_semantics<parallel>], iteration_bounds = array<i64: 2>, scalar_prefetch = 0 : i64, scratch_operands = 1 : i64, tpu.core_type = #tpu.core_type<tc>, window_params = [{transform_indices = @transform_0, window_bounds = array<i64: 1, 8, 256>}, {pipeline_mode = #tpu.pipeline_mode<synchronous>, transform_indices = @transform_1, window_bounds = array<i64: 8, 72>}, {pipeline_mode = #tpu.pipeline_mode<synchronous>, transform_indices = @transform_2, window_bounds = array<i64: 9, 256>}, {pipeline_mode = #tpu.pipeline_mode<synchronous>, transform_indices = @transform_3, window_bounds = array<i64: 8, 1>}, {transform_indices = @transform_4, window_bounds = array<i64: 1, 8, 256>}]} {
    %c0 = arith.constant 0 : index
    %c0_0 = arith.constant 0 : index
    %c0_1 = arith.constant 0 : index
    %0 = vector.load %arg1[%c0, %c0_0, %c0_1] : memref<1x8x256xf32, #tpu.memory_space<vmem>>, vector<1x8x256xf32>
    %c0_2 = arith.constant 0 : index
    %c0_3 = arith.constant 0 : index
    %1 = vector.load %arg2[%c0_2, %c0_3] : memref<8x72xf32, #tpu.memory_space<vmem>>, vector<8x72xf32>
    %c0_4 = arith.constant 0 : index
    %c0_5 = arith.constant 0 : index
    %2 = vector.load %arg4[%c0_4, %c0_5] : memref<8x1xf32, #tpu.memory_space<vmem>>, vector<8x1xf32>
    %3 = vector.shape_cast %0 : vector<1x8x256xf32> to vector<8x256xf32>
    %c17_i32 = arith.constant 17 : i32
    %4 = tpu.dynamic_rotate %3 by %c17_i32 dim 1 : vector<8x256xf32>, i32 -> vector<8x256xf32>
    %c0_6 = arith.constant 0 : index
    %c0_7 = arith.constant 0 : index
    %5 = vector.load %arg3[%c0_6, %c0_7] : memref<9x256xf32, #tpu.memory_space<vmem>>, vector<1x256xf32>
    %6 = vector.broadcast %5 : vector<1x256xf32> to vector<8x256xf32>
    %7 = arith.mulf %4, %6 : vector<8x256xf32>
    %c0_8 = arith.constant 0 : index
    %c0_9 = arith.constant 0 : index
    %c0_10 = arith.constant 0 : index
    %8 = vector.load %arg6[%c0_8, %c0_9, %c0_10] : memref<2x72x256xf32, #tpu.memory_space<vmem>>, vector<1x8x256xf32>
    %9 = vector.shape_cast %8 : vector<1x8x256xf32> to vector<8x256xf32>
    %10 = vector.shape_cast %7 : vector<8x256xf32> to vector<1x8x256xf32>
    tpu.vector_store %arg6[%c0_8, %c0_9, %c0_10], %10 {strides = array<i32>} : memref<2x72x256xf32, #tpu.memory_space<vmem>>, vector<1x8x256xf32>,
    %c16_i32 = arith.constant 16 : i32
    %11 = tpu.dynamic_rotate %3 by %c16_i32 dim 1 : vector<8x256xf32>, i32 -> vector<8x256xf32>
    %c1 = arith.constant 1 : index
    %c0_11 = arith.constant 0 : index
    %12 = vector.load %arg3[%c1, %c0_11] : memref<9x256xf32, #tpu.memory_space<vmem>>, vector<1x256xf32>
    %13 = vector.broadcast %12 : vector<1x256xf32> to vector<8x256xf32>
    %14 = arith.mulf %11, %13 : vector<8x256xf32>
    %c0_12 = arith.constant 0 : index
    %c8 = arith.constant 8 : index
    %c0_13 = arith.constant 0 : index
    %15 = vector.load %arg6[%c0_12, %c8, %c0_13] : memref<2x72x256xf32, #tpu.memory_space<vmem>>, vector<1x8x256xf32>
    %16 = vector.shape_cast %15 : vector<1x8x256xf32> to vector<8x256xf32>
    %17 = vector.shape_cast %14 : vector<8x256xf32> to vector<1x8x256xf32>
    tpu.vector_store %arg6[%c0_12, %c8, %c0_13], %17 {strides = array<i32>} : memref<2x72x256xf32, #tpu.memory_space<vmem>>, vector<1x8x256xf32>,
    %c15_i32 = arith.constant 15 : i32
    %18 = tpu.dynamic_rotate %3 by %c15_i32 dim 1 : vector<8x256xf32>, i32 -> vector<8x256xf32>
    %c2 = arith.constant 2 : index
    %c0_14 = arith.constant 0 : index
    %19 = vector.load %arg3[%c2, %c0_14] : memref<9x256xf32, #tpu.memory_space<vmem>>, vector<1x256xf32>
    %20 = vector.broadcast %19 : vector<1x256xf32> to vector<8x256xf32>
    %21 = arith.mulf %18, %20 : vector<8x256xf32>
    %c0_15 = arith.constant 0 : index
    %c16 = arith.constant 16 : index
    %c0_16 = arith.constant 0 : index
    %22 = vector.load %arg6[%c0_15, %c16, %c0_16] : memref<2x72x256xf32, #tpu.memory_space<vmem>>, vector<1x8x256xf32>
    %23 = vector.shape_cast %22 : vector<1x8x256xf32> to vector<8x256xf32>
    %24 = vector.shape_cast %21 : vector<8x256xf32> to vector<1x8x256xf32>
    tpu.vector_store %arg6[%c0_15, %c16, %c0_16], %24 {strides = array<i32>} : memref<2x72x256xf32, #tpu.memory_space<vmem>>, vector<1x8x256xf32>,
    %c1_i32 = arith.constant 1 : i32
    %25 = tpu.dynamic_rotate %3 by %c1_i32 dim 1 : vector<8x256xf32>, i32 -> vector<8x256xf32>
    %c3 = arith.constant 3 : index
    %c0_17 = arith.constant 0 : index
    %26 = vector.load %arg3[%c3, %c0_17] : memref<9x256xf32, #tpu.memory_space<vmem>>, vector<1x256xf32>
    %27 = vector.broadcast %26 : vector<1x256xf32> to vector<8x256xf32>
    %28 = arith.mulf %25, %27 : vector<8x256xf32>
    %c0_18 = arith.constant 0 : index
    %c24 = arith.constant 24 : index
    %c0_19 = arith.constant 0 : index
    %29 = vector.load %arg6[%c0_18, %c24, %c0_19] : memref<2x72x256xf32, #tpu.memory_space<vmem>>, vector<1x8x256xf32>
    %30 = vector.shape_cast %29 : vector<1x8x256xf32> to vector<8x256xf32>
    %31 = vector.shape_cast %28 : vector<8x256xf32> to vector<1x8x256xf32>
    tpu.vector_store %arg6[%c0_18, %c24, %c0_19], %31 {strides = array<i32>} : memref<2x72x256xf32, #tpu.memory_space<vmem>>, vector<1x8x256xf32>,
    %c0_20 = arith.constant 0 : index
    %c32 = arith.constant 32 : index
    %c0_21 = arith.constant 0 : index
    %32 = vector.load %arg6[%c0_20, %c32, %c0_21] : memref<2x72x256xf32, #tpu.memory_space<vmem>>, vector<1x8x256xf32>
    %33 = vector.shape_cast %32 : vector<1x8x256xf32> to vector<8x256xf32>
    %34 = vector.shape_cast %3 : vector<8x256xf32> to vector<1x8x256xf32>
    tpu.vector_store %arg6[%c0_20, %c32, %c0_21], %34 {strides = array<i32>} : memref<2x72x256xf32, #tpu.memory_space<vmem>>, vector<1x8x256xf32>,
    %c255_i32 = arith.constant 255 : i32
    %35 = tpu.dynamic_rotate %3 by %c255_i32 dim 1 : vector<8x256xf32>, i32 -> vector<8x256xf32>
    %c5 = arith.constant 5 : index
    %c0_22 = arith.constant 0 : index
    %36 = vector.load %arg3[%c5, %c0_22] : memref<9x256xf32, #tpu.memory_space<vmem>>, vector<1x256xf32>
    %37 = vector.broadcast %36 : vector<1x256xf32> to vector<8x256xf32>
    %38 = arith.mulf %35, %37 : vector<8x256xf32>
    %c0_23 = arith.constant 0 : index
    %c40 = arith.constant 40 : index
    %c0_24 = arith.constant 0 : index
    %39 = vector.load %arg6[%c0_23, %c40, %c0_24] : memref<2x72x256xf32, #tpu.memory_space<vmem>>, vector<1x8x256xf32>
    %40 = vector.shape_cast %39 : vector<1x8x256xf32> to vector<8x256xf32>
    %41 = vector.shape_cast %38 : vector<8x256xf32> to vector<1x8x256xf32>
    tpu.vector_store %arg6[%c0_23, %c40, %c0_24], %41 {strides = array<i32>} : memref<2x72x256xf32, #tpu.memory_space<vmem>>, vector<1x8x256xf32>,
    %c241_i32 = arith.constant 241 : i32
    %42 = tpu.dynamic_rotate %3 by %c241_i32 dim 1 : vector<8x256xf32>, i32 -> vector<8x256xf32>
    %c6 = arith.constant 6 : index
    %c0_25 = arith.constant 0 : index
    %43 = vector.load %arg3[%c6, %c0_25] : memref<9x256xf32, #tpu.memory_space<vmem>>, vector<1x256xf32>
    %44 = vector.broadcast %43 : vector<1x256xf32> to vector<8x256xf32>
    %45 = arith.mulf %42, %44 : vector<8x256xf32>
    %c0_26 = arith.constant 0 : index
    %c48 = arith.constant 48 : index
    %c0_27 = arith.constant 0 : index
    %46 = vector.load %arg6[%c0_26, %c48, %c0_27] : memref<2x72x256xf32, #tpu.memory_space<vmem>>, vector<1x8x256xf32>
    %47 = vector.shape_cast %46 : vector<1x8x256xf32> to vector<8x256xf32>
    %48 = vector.shape_cast %45 : vector<8x256xf32> to vector<1x8x256xf32>
    tpu.vector_store %arg6[%c0_26, %c48, %c0_27], %48 {strides = array<i32>} : memref<2x72x256xf32, #tpu.memory_space<vmem>>, vector<1x8x256xf32>,
    %c240_i32 = arith.constant 240 : i32
    %49 = tpu.dynamic_rotate %3 by %c240_i32 dim 1 : vector<8x256xf32>, i32 -> vector<8x256xf32>
    %c7 = arith.constant 7 : index
    %c0_28 = arith.constant 0 : index
    %50 = vector.load %arg3[%c7, %c0_28] : memref<9x256xf32, #tpu.memory_space<vmem>>, vector<1x256xf32>
    %51 = vector.broadcast %50 : vector<1x256xf32> to vector<8x256xf32>
    %52 = arith.mulf %49, %51 : vector<8x256xf32>
    %c0_29 = arith.constant 0 : index
    %c56 = arith.constant 56 : index
    %c0_30 = arith.constant 0 : index
    %53 = vector.load %arg6[%c0_29, %c56, %c0_30] : memref<2x72x256xf32, #tpu.memory_space<vmem>>, vector<1x8x256xf32>
    %54 = vector.shape_cast %53 : vector<1x8x256xf32> to vector<8x256xf32>
    %55 = vector.shape_cast %52 : vector<8x256xf32> to vector<1x8x256xf32>
    tpu.vector_store %arg6[%c0_29, %c56, %c0_30], %55 {strides = array<i32>} : memref<2x72x256xf32, #tpu.memory_space<vmem>>, vector<1x8x256xf32>,
    %c239_i32 = arith.constant 239 : i32
    %56 = tpu.dynamic_rotate %3 by %c239_i32 dim 1 : vector<8x256xf32>, i32 -> vector<8x256xf32>
    %c8_31 = arith.constant 8 : index
    %c0_32 = arith.constant 0 : index
    %57 = vector.load %arg3[%c8_31, %c0_32] : memref<9x256xf32, #tpu.memory_space<vmem>>, vector<1x256xf32>
    %58 = vector.broadcast %57 : vector<1x256xf32> to vector<8x256xf32>
    %59 = arith.mulf %56, %58 : vector<8x256xf32>
    %c0_33 = arith.constant 0 : index
    %c64 = arith.constant 64 : index
    %c0_34 = arith.constant 0 : index
    %60 = vector.load %arg6[%c0_33, %c64, %c0_34] : memref<2x72x256xf32, #tpu.memory_space<vmem>>, vector<1x8x256xf32>
    %61 = vector.shape_cast %60 : vector<1x8x256xf32> to vector<8x256xf32>
    %62 = vector.shape_cast %59 : vector<8x256xf32> to vector<1x8x256xf32>
    tpu.vector_store %arg6[%c0_33, %c64, %c0_34], %62 {strides = array<i32>} : memref<2x72x256xf32, #tpu.memory_space<vmem>>, vector<1x8x256xf32>,
    %c0_35 = arith.constant 0 : index
    %c0_36 = arith.constant 0 : index
    %c0_37 = arith.constant 0 : index
    %63 = vector.load %arg6[%c0_35, %c0_36, %c0_37] : memref<2x72x256xf32, #tpu.memory_space<vmem>>, vector<1x72x256xf32>
    %64 = vector.shape_cast %63 : vector<1x72x256xf32> to vector<72x256xf32>
    %cst = arith.constant dense<0.000000e+00> : vector<8x256xf32>
    %65 = tpu.matmul %1, %64, %cst {dimension_numbers = #tpu.dot_dimension_numbers<[1], [0], [0], [1], [0, 0, 1, 1], [], []>} : vector<8x72xf32>, vector<72x256xf32>, vector<8x256xf32> -> vector<8x256xf32>
    %66 = vector.broadcast %2 : vector<8x1xf32> to vector<8x256xf32>
    %67 = arith.addf %65, %66 : vector<8x256xf32>
    %c0_38 = arith.constant 0 : index
    %c0_39 = arith.constant 0 : index
    %c0_40 = arith.constant 0 : index
    %68 = vector.load %arg5[%c0_38, %c0_39, %c0_40] : memref<1x8x256xf32, #tpu.memory_space<vmem>>, vector<1x8x256xf32>
    %69 = vector.shape_cast %68 : vector<1x8x256xf32> to vector<8x256xf32>
    %70 = vector.shape_cast %67 : vector<8x256xf32> to vector<1x8x256xf32>
    tpu.vector_store %arg5[%c0_38, %c0_39, %c0_40], %70 {strides = array<i32>} : memref<1x8x256xf32, #tpu.memory_space<vmem>>, vector<1x8x256xf32>,
    return
  }
  func.func @transform_0(%arg0: i32) -> (i32, i32, i32) {
    %c0_i32 = arith.constant 0 : i32
    %c0_i32_0 = arith.constant 0 : i32
    %c0_i32_1 = arith.constant 0 : i32
    return %arg0, %c0_i32, %c0_i32_0 : i32, i32, i32
  }
  func.func @transform_1(%arg0: i32) -> (i32, i32) {
    %c0_i32 = arith.constant 0 : i32
    %c0_i32_0 = arith.constant 0 : i32
    %c0_i32_1 = arith.constant 0 : i32
    return %c0_i32, %c0_i32_0 : i32, i32
  }
  func.func @transform_2(%arg0: i32) -> (i32, i32) {
    %c0_i32 = arith.constant 0 : i32
    %c0_i32_0 = arith.constant 0 : i32
    %c0_i32_1 = arith.constant 0 : i32
    return %c0_i32, %c0_i32_0 : i32, i32
  }
  func.func @transform_3(%arg0: i32) -> (i32, i32) {
    %c0_i32 = arith.constant 0 : i32
    %c0_i32_0 = arith.constant 0 : i32
    %c0_i32_1 = arith.constant 0 : i32
    return %c0_i32, %c0_i32_0 : i32, i32
  }
  func.func @transform_4(%arg0: i32) -> (i32, i32, i32) {
    %c0_i32 = arith.constant 0 : i32
    %c0_i32_0 = arith.constant 0 : i32
    %c0_i32_1 = arith.constant 0 : i32
    return %arg0, %c0_i32, %c0_i32_0 : i32, i32, i32
  }
}

</mosaic_0001>

<bundles_post_ra>
// kernel: tpu_custom_call.1
= control target key start
LH: loop header
LB: loop body
LE: loop exit
PB: predicated region body
PF: predicated region fallthrough
CT: control target
= control target key end

     0   :  { %9 = vsyncpa [#allocation4], 0  ;;  %s1096_s0 = inlined_call_operand.hbm [shape: f32[2,8,256], index: 0, kind: input, shape index: {}]   ;;  %s1097_s1 = inlined_call_operand.vmem [shape: f32[8,72], index: 1, kind: input, shape index: {}]   ;;  %s1098_s2 = inlined_call_operand.hbm [shape: f32[9,256], index: 2, kind: input, shape index: {}]   ;;  %s1099_s3 = inlined_call_operand.vmem [shape: f32[8,1], index: 3, kind: input, shape index: {}]   ;;  %s1100_s4 = inlined_call_operand.hbm [shape: f32[2,8,256], index: 4, kind: output, shape index: {}]  }
   0x1   :  { %11 = vsyncpa [#allocation4 + $0x1], 0 }
   0x2   :  { %12 = vsyncpa [#allocation7], 0 }
   0x3   :  { %13 = vsyncpa [#allocation5], 0 }
   0x4   :  { %15 = vsyncpa [#allocation5 + $0x1], 0  ;;  %s876_s15 = smov 0   ;;  %s878_s16 = smov 0  }
   0x5   :  { %s880_s17 = smov 0   ;;  %s882_s18 = smov 0  }
   0x6 LB: > { %s897_s19 = sadd.s32 4294967295, %s834_s18   ;;  %s623_s20 = sadd.s32 4294967294, %s834_s18   ;;  %s834_s18 = sphi %s882_s18, %s1122_s18   ;;  %s830_s17 = sphi %s880_s17, %s1121_s17   ;;  %s826_s16 = sphi %s878_s16, %s1120_s16   ;;  %s822_s15 = sphi %s876_s15, %s1119_s15  }
   0x7   : > { %p41_p0 = scmp.ne.s32.totalorder %s826_s16, %s822_s15  ;;  %p1101_p1 = scmp.eq.s32.totalorder %s897_s19, 0 }
   0x8   : > { %p134_p3 = scmp.eq.s32.totalorder %s623_s20, 1  ;;  %p624_p5 = scmp.ge.s32.totalorder %s834_s18, 1 }
   0x9   : > { %p906_p4 = por %p1101_p1, %p41_p0  ;;  %p141_p7 = scmp.lt.s32.totalorder %s834_s18, 3 }
   0xa   : > { %p911_p6 = por %p134_p3, %p41_p0  ;;  %s836_s24 = smov [#allocation6]  }
   0xb   : > { %s1105_s21 = scalar_select %p906_p4, 1, 0 }
   0xc   : > { %s1106_s22 = scalar_select %p911_p6, 1, 0 }
   0xd   : > { %p916_p8 = pnand %p624_p5, %p141_p7  ;;  %s156_s25 = sshll.u32 %s836_s24, 4  ;;  %s157_s25 = int_to_ptr.vmem [resolvable:$true] %s156_s25 }
   0xe   : > { %s930_s27 = sadd.s32 1, %s834_s18   ;;  %s28_s28 = sadd.s32 1, %s830_s17 }
   0xf   : > { %s1107_s23 = scalar_select %p916_p8, 1, 0 }
  0x10   : > { %p650_p9 = pneg %p916_p8  ;;  %s25_s29 = ssub.s32 %s834_s18, %s930_s27 }
  0x11   : > { %s723_s30 = scalar_lea.vmem %s157_s25, 512  ;;  %p731_p5 = scmp.lt.s32.totalorder %s157_s25, %s157_s25 }
  0x12   : > { %p925_p11 = pnand %p650_p9, %p1101_p1  ;;  %p724_p13 = scmp.ne.s32.totalorder %s157_s25, %s723_s30 }
  0x13   : > { %p732_p7 = scmp.lt.s32.totalorder %s723_s30, %s723_s30 }
  0x14   : > { %p714_p12 = pneg %p925_p11 }
  0x15   : > { %p733_p10 = por %p732_p7, %p731_p5 }
  0x16   : > { %p726_p0 = pnand %p724_p13, %p714_p12 }
  0x18   : > { %p727_p3 = pneg %p726_p0 }
  0x1a   : > { %p734_p2 = pnand %p733_p10, %p727_p3 }
  0x1c   : > { %737 = shalt.err (!%p734_p2)
}
  0x1d   : > { %s837_s5 = smov 256   ;;  %s838_s6 = smov 16  }
  0x1e   : > { %653 = dma.hbm_to_vmem [thread:$0]  (!%p925_p11), %s1098_s2, 512, %s157_s25, [#allocation7], %s837_s5, %s837_s5, %s838_s6  }
  0x1f   : > { %p26_p9 = scmp.eq.s32.totalorder %s25_s29, 0  ;;  %p35_p12 = scmp.ne.s32.totalorder %s830_s17, %s826_s16 }
  0x20   : > { %p36_p10 = scmp.eq.s32.totalorder %s834_s18, 0  ;;  %p663_p2 = scmp.lt.s32.totalorder %s834_s18, 2 }
  0x21   : > { %s947_s9 = scalar_select %p26_p9, %s830_s17, %s28_s28  }
  0x22   : > { %p37_p13 = por %p36_p10, %p35_p12  ;;  %p1109_p0 = scmp.eq.s32.totalorder %s897_s19, 1 }
  0x23   : > { %s173_s11 = sand.u32 1, %s830_s17   ;;  %s640_s12 = sshll.u32 %s834_s18, 8 }
  0x24   : > { %p951_p3 = por %p1109_p0, %p35_p12  ;;  %s627_s13 = sshll.u32 %s173_s11, 4 }
  0x25   : > { %s960_s24 = scalar_lea.hbm %s1096_s0, %s640_s12  ;;  %s177_s25 = scalar_lea.vmem [#allocation3], %s627_s13 }
  0x26   : > { %s1110_s10 = scalar_select %p951_p3, 1, 0 }
  0x27   : > { %s185_s26 = sshll.u32 %s177_s25, 4  ;;  %p962_p11 = pnand %p663_p2, %p37_p13  ;;  %s186_s26 = int_to_ptr.vmem [resolvable:$true] %s185_s26 }
  0x28   : > { %s174_s29 = scalar_lea.sflag [#allocation4], %s173_s11  ;;  %s738_s30 = scalar_lea.hbm %s960_s24, 256 }
  0x29   : > { %p739_p5 = scmp.ne.s32.totalorder %s960_s24, %s738_s30  ;;  %p740_p7 = pneg %p962_p11 }
  0x2a   : > { %s743_s7 = scalar_lea.hbm %s1096_s0, 512  ;;  %p744_p10 = scmp.lt.s32.totalorder %s960_s24, %s1096_s0 }
  0x2b   : > { %p741_p9 = pnand %p740_p7, %p739_p5  ;;  %p745_p2 = scmp.lt.s32.totalorder %s743_s7, %s738_s30 }
  0x2d   : > { %p742_p12 = pneg %p741_p9  ;;  %p746_p13 = por %p745_p2, %p744_p10 }
  0x2f   : > { %p747_p0 = pnand %p746_p13, %p742_p12 }
  0x31   : > { %750 = shalt.err (!%p747_p0)
}
  0x32   : > { %s751_s13 = scalar_lea.vmem %s186_s26, 256  ;;  %s839_s11 = smov [#allocation3]  }
  0x33   : > { %p752_p1 = scmp.ne.s32.totalorder %s186_s26, %s751_s13  ;;  %s756_s14 = sshll.u32 %s839_s11, 4  ;;  %s757_s14 = int_to_ptr.vmem [resolvable:$false] %s756_s14 }
  0x34   : > { %s758_s20 = scalar_lea.vmem %s757_s14, 512  ;;  %p759_p5 = scmp.lt.s32.totalorder %s186_s26, %s757_s14 }
  0x35   : > { %p754_p6 = pnand %p752_p1, %p740_p7  ;;  %p760_p9 = scmp.lt.s32.totalorder %s758_s20, %s751_s13 }
  0x37   : > { %p755_p3 = pneg %p754_p6  ;;  %p761_p4 = por %p760_p9, %p759_p5 }
  0x39   : > { %p762_p8 = pnand %p761_p4, %p755_p3 }
  0x3b   : > { %765 = shalt.err (!%p762_p8)
}
  0x3c   : > { %657 = dma.hbm_to_vmem [thread:$0]  (!%p962_p11), %s960_s24, 256, %s186_s26, %s174_s29  }
  0x3d   : > { %p1112_p12 = scmp.ne.s32.totalorder %s1107_s23, 0 }
  0x3e   : > { %s983_s25 = sand.u32 (!%p1112_p12), 1, %s826_s16   ;;  %p1113_p1 = scmp.ne.s32.totalorder (!%p1112_p12), %s1105_s21, 0 }
  0x3f   : > { %194 = sbr.rel (%p1112_p12) target bundleno = 431 (0x1af), region = 36  ;;  %s631_s30 = sshll.u32 (!%p1112_p12), %s983_s25, 4 }
  0x40   : > { %s197_s5 = scalar_lea.sflag (!%p1112_p12), [#allocation4], %s983_s25  ;;  %s200_s6 = scalar_lea.vmem (!%p1112_p12), [#allocation3], %s631_s30 }
  0x44   : > { %809 = dma.done.wait (%p1113_p1), %s197_s5, 256  }
  0x45   : > { %811 = vsyncadd (%p1113_p1), %s197_s5, 4294967040  ;;  %p1114_p4 = scmp.eq.s32.totalorder %s897_s19, 0 }
  0x47   : > { %813 = dma.done.wait (%p1114_p4), [#allocation7], 512   ;;  %p1115_p6 = pmov %p1114_p4 }
  0x48   : > { %v997_v0 = vld [vmem:[%s200_s6] sm:$0xff]  ;;  %s840_s23 = smov 112   ;;  %s841_s24 = smov 111   ;;  %v1001_v1 = vld [vmem:[%s200_s6 + $0x8] sm:$0xff]  ;;  %v845_v2 = vmov 0.0   ;;  %v847_v3 = vmov 0   ;;  %v237_v5 = vlaneseq }
  0x49   : > { %815 = vsyncadd (%p1115_p6), [#allocation7], 4294966784  ;;  %380 = vrot.lane.b32.xlu1 %v997_v0, %s840_s23  ;;  %404 = vrot.lane.b32.xlu0 %v997_v0, %s841_s24  ;;  %s842_s21 = smov 113   ;;  %s843_s26 = smov 127   ;;  %v232_v4 = vld [vmem:[%s1099_s3] sm:$0xff]  ;;  %vm451_vm8 = vcmask 588800  }
  0x4a   : > { %s844_s28 = smov 1   ;;  %519 = vmatprep.mubr.f32.mxu0 %v845_v2  ;;  %s846_s29 = smov 15   ;;  %711 = vset.pattern.permute.xlu0 %v847_v3  ;;  %v245_v6 = vshrl.u32 %v237_v5, 7  ;;  %v1020_v7 = vand.u32 127, %v237_v5 }
  0x4b   : > { %s848_s7 = smov 16   ;;  %s849_s8 = smov 17   ;;  %v412_v10 = vld [vmem:[#allocation6 + $0x10] ss:$8 sm:$0x3] }
  0x4c   : > { %v1022_v8 = vsub.s32 0, %v245_v6  ;;  %v1024_v9 = vsub.s32 1, %v245_v6  ;;  %v388_v13 = vld [vmem:[#allocation6 + $0x7] ss:$8 sm:$0x3]  ;;  %vm384_vm0 = vcmp.lt.s32.totalorder %v1020_v7, 112 }
  0x4d   : > { %382 = vrot.lane.b32.xlu1 %v1001_v1, %s840_s23  ;;  %406 = vrot.lane.b32.xlu0 %v1001_v1, %s841_s24  ;;  %vm408_vm1 = vcmp.lt.s32.totalorder %v1020_v7, 111  ;;  %v364_v15 = vld [vmem:[#allocation6 + $0x6] ss:$8 sm:$0x3]  ;;  %vm360_vm2 = vcmp.lt.s32.totalorder %v1020_v7, 113  ;;  %vm336_vm3 = vcmp.lt.s32.totalorder %v1020_v7, 127 }
  0x4e   : > { %v421_v14 = vrot.slane %v412_v10, %v1024_v9  ;;  %v417_v16 = vrot.slane %v412_v10, %v1022_v8  ;;  %v393_v17 = vrot.slane %v388_v13, %v1022_v8  ;;  %v397_v18 = vrot.slane %v388_v13, %v1024_v9  ;;  %v340_v29 = vld [vmem:[#allocation6 + $0x5] ss:$8 sm:$0x3]  ;;  %v314_v40 = vld [vmem:[#allocation6 + $0x3] ss:$8 sm:$0x3] }
  0x4f   : > { %v369_v24 = vrot.slane %v364_v15, %v1022_v8  ;;  %v373_v27 = vrot.slane %v364_v15, %v1024_v9  ;;  %v345_v38 = vrot.slane %v340_v29, %v1022_v8  ;;  %v349_v39 = vrot.slane %v340_v29, %v1024_v9  ;;  %v290_v49 = vld [vmem:[#allocation6 + $0x2] ss:$8 sm:$0x3]  ;;  %v266_v58 = vld [vmem:[#allocation6 + $0x1] ss:$8 sm:$0x3] }
  0x50   : > { %vm310_vm4 = vcmp.lt.s32.totalorder %v1020_v7, 1  ;;  %v319_v47 = vrot.slane %v314_v40, %v1022_v8  ;;  %v323_v48 = vrot.slane %v314_v40, %v1024_v9  ;;  %vm286_vm5 = vcmp.lt.s32.totalorder %v1020_v7, 15  ;;  %s641_s20 = sshll.u32 %s897_s19, 8  ;;  %s228_s5 = scalar_lea.vmem [#allocation8], %s631_s30 }
  0x51   : > { %358 = vrot.lane.b32.xlu1 %v1001_v1, %s842_s21  ;;  %356 = vrot.lane.b32.xlu0 %v997_v0, %s842_s21  ;;  %v295_v56 = vrot.slane %v290_v49, %v1022_v8  ;;  %v299_v57 = vrot.slane %v290_v49, %v1024_v9  ;;  %vm262_vm6 = vcmp.lt.s32.totalorder %v1020_v7, 16  ;;  %v271_v3 = vrot.slane %v266_v58, %v1022_v8  ;;  %s543_s6 = sshll.u32 %s228_s5, 4  ;;  %s541_s21 = scalar_lea.hbm %s1100_s4, %s641_s20  ;;  %s544_s6 = int_to_ptr.vmem [resolvable:$true] %s543_s6 }
  0x52   : > { %vm239_vm7 = vcmp.lt.s32.totalorder %v1020_v7, 17  ;;  %v231_v7 = vld [vmem:[%s1097_s1] sm:$0xff]  ;;  %p1116_p3 = scmp.ne.s32.totalorder %s1110_s10, 0  ;;  %s850_s19 = smov [#allocation8]  }
  0x55   : > { %334 = vrot.lane.b32.xlu1 %v1001_v1, %s843_s26  ;;  %332 = vrot.lane.b32.xlu0 %v997_v0, %s843_s26  ;;  %s529_s26 = scalar_lea.sflag [#allocation5], %s983_s25 }
  0x59   : > { %308 = vrot.lane.b32.xlu1 %v1001_v1, %s844_s28  ;;  %306 = vrot.lane.b32.xlu0 %v997_v0, %s844_s28  ;;  %s766_s28 = scalar_lea.vmem %s544_s6, 256 }
  0x5a   : > { %p767_p8 = scmp.ne.s32.totalorder %s544_s6, %s766_s28 }
  0x5c   : > { %p768_p11 = pnand %p767_p8, %p1116_p3 }
  0x5d   : > { %284 = vrot.lane.b32.xlu1 %v1001_v1, %s846_s29  ;;  %282 = vrot.lane.b32.xlu0 %v997_v0, %s846_s29  ;;  %s770_s29 = sshll.u32 %s850_s19, 4  ;;  %s771_s29 = int_to_ptr.vmem [resolvable:$false] %s770_s29 }
  0x5e   : > { %p769_p7 = pneg %p768_p11  ;;  %s772_s30 = scalar_lea.vmem %s771_s29, 512 }
  0x5f   : > { %p773_p10 = scmp.lt.s32.totalorder %s544_s6, %s771_s29  ;;  %p774_p2 = scmp.lt.s32.totalorder %s772_s30, %s766_s28 }
  0x61   : > { %260 = vrot.lane.b32.xlu1 %v1001_v1, %s848_s7  ;;  %258 = vrot.lane.b32.xlu0 %v997_v0, %s848_s7  ;;  %p775_p13 = por %p774_p2, %p773_p10 }
  0x63   : > { %p776_p0 = pnand %p775_p13, %p769_p7 }
  0x65   : > { %235 = vrot.lane.b32.xlu1 %v1001_v1, %s849_s8  ;;  %233 = vrot.lane.b32.xlu0 %v997_v0, %s849_s8 }
  0x69   : > { %448 = vperm.xlu0 %711, %v232_v4   ;;  %v242_v4 = vld [vmem:[#allocation6] ss:$8 sm:$0x3] }
  0x6a   : > { %v247_v13 = vrot.slane %v242_v4, %v1022_v8 }
  0xbb   : > { %v381_v11 = vpop.permute.xlu1 %380  ;;  %v405_v12 = vpop.permute.xlu0 %404 }
  0xbf   : > { %v383_v19 = vpop.permute.xlu1 %382  ;;  %v407_v20 = vpop.permute.xlu0 %406 }
  0xc0   : > { %v386_v21 = vsel %vm384_vm0, %v383_v19, %v381_v11  ;;  %v409_v22 = vsel %vm408_vm1, %v405_v12, %v407_v20  ;;  %v410_v23 = vsel %vm408_vm1, %v407_v20, %v405_v12  ;;  %v385_v25 = vsel %vm384_vm0, %v381_v11, %v383_v19 }
  0xc1   : > { %v425_v26 = vmul.f32 %v421_v14, %v410_v23  ;;  %v424_v28 = vmul.f32 %v417_v16, %v409_v22  ;;  %v401_v30 = vmul.f32 %v397_v18, %v386_v21  ;;  %v400_v33 = vmul.f32 %v393_v17, %v385_v25 }
  0xc2   : > { %v251_v14 = vrot.slane %v242_v4, %v1024_v9 }
  0xc3   : > { %v359_v31 = vpop.permute.xlu1 %358  ;;  %469 = vmatprep.subr.mxu0 %v425_v26  ;;  %v357_v32 = vpop.permute.xlu0 %356 }
  0xc4   : > { %v361_v34 = vsel %vm360_vm2, %v357_v32, %v359_v31  ;;  %v362_v35 = vsel %vm360_vm2, %v359_v31, %v357_v32  ;;  %470 = vmatpush1.msra.mxu0 %v424_v28 }
  0xc5   : > { %v376_v36 = vmul.f32 %v369_v24, %v361_v34  ;;  %v377_v37 = vmul.f32 %v373_v27, %v362_v35  ;;  %471 = vmatprep.subr.mxu0 %v401_v30 }
  0xc6   : > { %472 = vmatpush1.msra.mxu0 %v400_v33 }
  0xc7   : > { %v335_v41 = vpop.permute.xlu1 %334  ;;  %473 = vmatprep.subr.mxu0 %v377_v37  ;;  %v333_v42 = vpop.permute.xlu0 %332 }
  0xc8   : > { %v337_v43 = vsel %vm336_vm3, %v333_v42, %v335_v41  ;;  %v338_v44 = vsel %vm336_vm3, %v335_v41, %v333_v42  ;;  %474 = vmatpush1.msra.mxu0 %v376_v36 }
  0xc9   : > { %v352_v45 = vmul.f32 %v345_v38, %v337_v43  ;;  %v353_v46 = vmul.f32 %v349_v39, %v338_v44 }
  0xcb   : > { %v309_v50 = vpop.permute.xlu1 %308  ;;  %475 = vmatprep.subr.mxu0 %v353_v46  ;;  %v307_v51 = vpop.permute.xlu0 %306 }
  0xcc   : > { %v311_v52 = vsel %vm310_vm4, %v307_v51, %v309_v50  ;;  %v312_v53 = vsel %vm310_vm4, %v309_v50, %v307_v51  ;;  %476 = vmatpush1.msra.mxu0 %v352_v45 }
  0xcd   : > { %v326_v54 = vmul.f32 %v319_v47, %v312_v53  ;;  %v327_v55 = vmul.f32 %v323_v48, %v311_v52  ;;  %477 = vmatprep.subr.mxu0 %v1001_v1  ;;  %v275_v1 = vrot.slane %v266_v58, %v1024_v9 }
  0xce   : > { %478 = vmatpush1.msra.mxu0 %v997_v0 }
  0xcf   : > { %v285_v59 = vpop.permute.xlu1 %284  ;;  %479 = vmatprep.subr.mxu0 %v327_v55  ;;  %v283_v60 = vpop.permute.xlu0 %282 }
  0xd0   : > { %v287_v61 = vsel %vm286_vm5, %v283_v60, %v285_v59  ;;  %v288_v62 = vsel %vm286_vm5, %v285_v59, %v283_v60  ;;  %480 = vmatpush1.msra.mxu0 %v326_v54 }
  0xd1   : > { %v302_v63 = vmul.f32 %v295_v56, %v288_v62  ;;  %v303_v2 = vmul.f32 %v299_v57, %v287_v61 }
  0xd3   : > { %v261_v5 = vpop.permute.xlu1 %260  ;;  %481 = vmatprep.subr.mxu0 %v303_v2  ;;  %v259_v6 = vpop.permute.xlu0 %258 }
  0xd4   : > { %v263_v0 = vsel %vm262_vm6, %v259_v6, %v261_v5  ;;  %v264_v10 = vsel %vm262_vm6, %v261_v5, %v259_v6  ;;  %482 = vmatpush1.msra.mxu0 %v302_v63 }
  0xd5   : > { %v278_v11 = vmul.f32 %v271_v3, %v264_v10  ;;  %v279_v12 = vmul.f32 %v275_v1, %v263_v0 }
  0xd7   : > { %v236_v15 = vpop.permute.xlu1 %235  ;;  %483 = vmatprep.subr.mxu0 %v279_v12  ;;  %v234_v16 = vpop.permute.xlu0 %233 }
  0xd8   : > { %v240_v17 = vsel %vm239_vm7, %v234_v16, %v236_v15  ;;  %v241_v18 = vsel %vm239_vm7, %v236_v15, %v234_v16  ;;  %484 = vmatpush1.msra.mxu0 %v278_v11 }
  0xd9   : > { %v254_v19 = vmul.f32 %v247_v13, %v241_v18  ;;  %v255_v20 = vmul.f32 %v251_v14, %v240_v17 }
  0xdb   : > { %485 = vmatprep.subr.mxu0 %v255_v20 }
  0xdc   : > { %486 = vmatpush1.msra.mxu0 %v254_v19 }
  0xdd   : > { %634 = vmatmul.mubr.msk.f32.vlgmr.msra.gmra.mxu0 %vm451_vm8, %v231_v7 }
  0xe4   : > { %v449_v8 = vpop.permute.xlu0 %448 }
 0x19d   : > { %v521_v9 = vpop.f32.mrf.mxu0 }
 0x19e   : > { %v522_v21 = vadd.f32 %v521_v9, %v449_v8 }
 0x19f   : > { %v523_v22 = vpop.f32.mrf.mxu0 }
 0x1a0   : > { %526 = vst [vmem:[%s228_s5] sm:$0xff] %v522_v21  ;;  %v524_v23 = vadd.f32 %v523_v22, %v449_v8 }
 0x1a2   : > { %527 = vst [vmem:[%s228_s5 + $0x8] sm:$0xff] %v524_v23 }
 0x1a3   : > { %779 = shalt.err (!%p776_p0)
}
 0x1a4   : > { %s780_s7 = scalar_lea.hbm %s541_s21, 256  ;;  %s784_s12 = scalar_lea.hbm %s1100_s4, 512 }
 0x1a5   : > { %p781_p5 = scmp.ne.s32.totalorder %s541_s21, %s780_s7  ;;  %p785_p1 = scmp.lt.s32.totalorder %s541_s21, %s1100_s4 }
 0x1a6   : > { %p786_p4 = scmp.lt.s32.totalorder %s784_s12, %s780_s7 }
 0x1a7   : > { %p782_p9 = pnand %p781_p5, %p1116_p3 }
 0x1a8   : > { %p787_p6 = por %p786_p4, %p785_p1 }
 0x1a9   : > { %p783_p12 = pneg %p782_p9 }
 0x1ab   : > { %p788_p8 = pnand %p787_p6, %p783_p12 }
 0x1ad   : > { %791 = shalt.err (!%p788_p8)
}
 0x1ae   : > { %648 = dma.vmem_to_hbm [thread:$0]  (%p1116_p3), %s544_s6, 256, %s541_s21, %s529_s26  }
 0x1af PF: > { %s555_s14 = sand.u32 1, %s822_s15   ;;  %p1117_p11 = scmp.ne.s32.totalorder %s1106_s22, 0 }
 0x1b0   : > { %p1118_p7 = scmp.ge.s32.totalorder %s834_s18, 2  ;;  %s556_s20 = scalar_lea.sflag [#allocation5], %s555_s14 }
 0x1b2   : > { %p659_p10 = pnand %p1118_p7, %p1117_p11 }
 0x1b4   : > { %p660_p2 = pneg %p659_p10 }
 0x1b6   : > { %817 = dma.done.wait (%p660_p2), %s556_s20, 256  }
 0x1b7   : > { %819 = vsyncadd (%p660_p2), %s556_s20, 4294967040  ;;  %p18_p13 = scmp.ge.s32.totalorder %s930_s27, 4   ;;  %s1119_s15 = smov %s826_s16 }
 0x1b8   : > { %s1120_s16 = smov %s830_s17  ;;  %s1121_s17 = smov %s947_s9 }
 0x1b9   : > { %s1122_s18 = smov %s930_s27  ;;  %20 = sbr.rel (!%p18_p13) target bundleno = 6 (0x6), region = 92 }
 0x1be   :  { %561 = vsyncpa [#allocation4], 1 }
 0x1bf   :  { %563 = vsyncpa [#allocation4 + $0x1], 1 }
 0x1c0   :  { %564 = vsyncpa [#allocation7], 1 }
 0x1c1   :  { %565 = vsyncpa [#allocation5], 1 }
 0x1c2   :  { %567 = vsyncpa [#allocation5 + $0x1], 1 }

</bundles_post_ra>
